<compile_context>
chip_gen: v5e
topology: v5e:2x2
jax: 0.10.0
libtpu: 0.0.40
codegen_flags: <defaults>
</compile_context>

<pallas_src>
import functools

import jax
import jax.numpy as jnp
from jax.experimental import pallas as pl
from jax.experimental.pallas import tpu as pltpu

LANE = 128


def _ray_relu_kernel(pred_ref, ray_ref, out_ref, *, eps, cos_eps_sq, norm_eps_sq):
    # Block shapes: (1, C, S, 128). All reductions are over axis 1 (channels),
    # a leading (non-vreg) dim -> dense VPU adds, no XLU traffic.
    p = pred_ref[...].astype(jnp.float32)
    r = ray_ref[...].astype(jnp.float32)

    dot = jnp.sum(p * r, axis=1, keepdims=True)          # (1, 1, S, 128)
    pp = jnp.sum(p * p, axis=1, keepdims=True)
    rr = jnp.sum(r * r, axis=1, keepdims=True)

    # cosine_similarity: dot / max(||p||*||r||, 1e-8)
    #   == dot * rsqrt(max(pp*rr, 1e-16))  (eps squared to match the clamp).
    # NOTE: pp*rr squares the dynamic range; fine for (near-)unit normals/rays.
    cos = dot * jax.lax.rsqrt(jnp.maximum(pp * rr, cos_eps_sq))

    # relu(cos - eps) + eps - cos == relu(eps - cos)
    new_p = p + r * jnp.maximum(eps - cos, 0.0)

    # F.normalize(dim=1): x / clamp_min(||x||, 1e-12) == x * rsqrt(max(||x||^2, 1e-24))
    nn_sq = jnp.sum(new_p * new_p, axis=1, keepdims=True)
    out = new_p * jax.lax.rsqrt(jnp.maximum(nn_sq, norm_eps_sq))

    out_ref[...] = out.astype(out_ref.dtype)


def _pick_sublane_tile(N, B, dtype, max_sublanes, min_total_steps=4):
    """Pick the spatial tile height S (second-to-last block dim).

    - S is a multiple of the sublane packing (8 for 4-byte, 16 for 2-byte,
      32 for 1-byte dtypes), or equals the full extent N when N is tiny.
    - S is shrunk (by halving) until B * ceil(N/S) >= min_total_steps so the
      grid has enough steps to shard across v7x's two TensorCores and to keep
      the DMA pipeline busy. Ragged last blocks are legal since S stays a
      multiple of the packing.
    """
    itemsize = jnp.dtype(dtype).itemsize
    sub_mult = {4: 8, 2: 16, 1: 32}.get(itemsize, 8)
    if N <= sub_mult:
        return N                                   # full-extent block, always legal
    S = min(int(max_sublanes), N)
    S = max(sub_mult, (S // sub_mult) * sub_mult)
    while S > sub_mult and B * pl.cdiv(N, S) < min_total_steps:
        S = max(sub_mult, ((S // 2) // sub_mult) * sub_mult)
    return S


def ray_relu(pred_norm, ray, *, eps=0.01, max_sublanes=1024):
    """pred_norm, ray: (B, C, H, W) NCHW. Returns (B, C, H, W).

    max_sublanes: spatial tile = S * 128 elements per channel, S <= max_sublanes.
    Default 1024 -> per-step block ~= C*1024*128*4 B = 1.5 MiB per array (f32,
    C=3); with 3 arrays x 2 pipeline buffers that is ~9 MiB, comfortably inside
    the 32 MiB scoped VMEM limit on v5e/v6e/v7x.
    """
    B, C, H, W = pred_norm.shape
    HW = H * W
    N = pl.cdiv(HW, LANE)
    HW_lanes = N * LANE
    needs_lane_pad = HW_lanes != HW

    pred_f = pred_norm.reshape(B, C, HW)
    ray_f = ray.reshape(B, C, HW)
    if needs_lane_pad:
        # Only pad the flattened spatial axis up to a full 128-lane row; the
        # pad is allowed to fuse into the pallas_call (allow_input_fusion).
        pad = HW_lanes - HW
        pred_f = jnp.pad(pred_f, ((0, 0), (0, 0), (0, pad)))
        ray_f = jnp.pad(ray_f, ((0, 0), (0, 0), (0, pad)))

    pred_4 = pred_f.reshape(B, C, N, LANE)
    ray_4 = ray_f.reshape(B, C, N, LANE)

    S = _pick_sublane_tile(N, B, pred_norm.dtype, max_sublanes)

    kernel = functools.partial(
        _ray_relu_kernel,
        eps=float(eps),
        cos_eps_sq=1e-16,    # (1e-8)^2  -> matches max(||p||*||r||, 1e-8)
        norm_eps_sq=1e-24,   # (1e-12)^2 -> matches clamp_min(||x||, 1e-12)
    )

    spec = pl.BlockSpec((1, C, S, LANE), lambda b, t: (b, 0, t, 0))

    out = pl.pallas_call(
        kernel,
        out_shape=jax.ShapeDtypeStruct((B, C, N, LANE), pred_norm.dtype),
        grid_spec=pl.GridSpec(
            grid=(B, pl.cdiv(N, S)),              # ragged last spatial block is OK
            in_specs=[spec, spec],
            out_specs=spec,
        ),
        compiler_params=pltpu.CompilerParams(
            dimension_semantics=("parallel", "parallel"),
            vmem_limit_bytes=32 * 1024 * 1024,
            allow_input_fusion=[0, 1] if needs_lane_pad else None,
        ),
    )(pred_4, ray_4)

    if needs_lane_pad:
        out = out.reshape(B, C, HW_lanes)[:, :, :HW]
    return out.reshape(B, C, H, W)


def _ray_relu_reference(pred_norm, ray, eps=0.01):
    """Pure-JAX reference mirroring the PyTorch module."""
    dot = jnp.sum(pred_norm * ray, axis=1, keepdims=True)
    pn = jnp.linalg.norm(pred_norm, axis=1, keepdims=True)
    rn = jnp.linalg.norm(ray, axis=1, keepdims=True)
    cos = dot / jnp.maximum(pn * rn, 1e-8)
    norm_along_view = ray * cos
    norm_along_view_relu = ray * (jax.nn.relu(cos - eps) + eps)
    new_pred_norm = pred_norm + (norm_along_view_relu - norm_along_view)
    denom = jnp.maximum(
        jnp.linalg.norm(new_pred_norm, axis=1, keepdims=True), 1e-12
    )
    return new_pred_norm / denom


if __name__ == "__main__":
    key = jax.random.PRNGKey(0)
    k1, k2, k3, k4, k5, k6 = jax.random.split(key, 6)

    # Shape 1: small, lane-aligned spatial size (H*W multiple of 128).
    B, C, H, W = 2, 3, 16, 16  # normals / rays have 3 channels
    pred_norm = jax.random.normal(k1, (B, C, H, W), dtype=jnp.float32)
    ray = jax.random.normal(k2, (B, C, H, W), dtype=jnp.float32)
    ray = ray / jnp.linalg.norm(ray, axis=1, keepdims=True)

    out = jax.block_until_ready(ray_relu(pred_norm, ray))
    ref = _ray_relu_reference(pred_norm, ray)
    assert out.shape == (B, C, H, W)
    assert jnp.allclose(out, ref, atol=1e-5, rtol=1e-5), "mismatch vs reference (aligned)"

    # Shape 2: H*W not a multiple of 128 -> exercises the lane-padding path.
    H2, W2 = 24, 20
    pred2 = jax.random.normal(k3, (B, C, H2, W2), dtype=jnp.float32)
    ray2 = jax.random.normal(k4, (B, C, H2, W2), dtype=jnp.float32)
    ray2 = ray2 / jnp.linalg.norm(ray2, axis=1, keepdims=True)

    out2 = jax.block_until_ready(ray_relu(pred2, ray2))
    ref2 = _ray_relu_reference(pred2, ray2)
    assert out2.shape == (B, C, H2, W2)
    assert jnp.allclose(out2, ref2, atol=1e-5, rtol=1e-5), "mismatch vs reference (padded)"

    # Shape 3: H*W multiple of 128 but N not a multiple of S -> exercises the
    # ragged-last-block path (no sublane padding, no output slice-copy).
    H3, W3 = 16, 80  # HW = 1280 -> N = 10; max_sublanes=8 -> S = 8, ragged tail = 2
    pred3 = jax.random.normal(k5, (B, C, H3, W3), dtype=jnp.float32)
    ray3 = jax.random.normal(k6, (B, C, H3, W3), dtype=jnp.float32)
    ray3 = ray3 / jnp.linalg.norm(ray3, axis=1, keepdims=True)

    out3 = jax.block_until_ready(ray_relu(pred3, ray3, max_sublanes=8))
    ref3 = _ray_relu_reference(pred3, ray3)
    assert out3.shape == (B, C, H3, W3)
    assert jnp.allclose(out3, ref3, atol=1e-5, rtol=1e-5), "mismatch vs reference (ragged)"

    print("KERNEL_OK")
</pallas_src>

<mosaic_0001>
module attributes {stable_mosaic.version = 11 : i64} {
  func.func @_ray_relu_kernel(%arg0: i32, %arg1: i32, %arg2: memref<1x3x2x128xf32, #tpu.memory_space<vmem>>, %arg3: memref<1x3x2x128xf32, #tpu.memory_space<vmem>>, %arg4: memref<1x3x2x128xf32, #tpu.memory_space<vmem>>) attributes {dimension_semantics = [#tpu.dimension_semantics<parallel>, #tpu.dimension_semantics<parallel>], iteration_bounds = array<i64: 2, 1>, scalar_prefetch = 0 : i64, scratch_operands = 0 : i64, tpu.core_type = #tpu.core_type<tc>, window_params = [{transform_indices = @transform_0, window_bounds = array<i64: 1, 3, 2, 128>}, {transform_indices = @transform_1, window_bounds = array<i64: 1, 3, 2, 128>}, {transform_indices = @transform_2, window_bounds = array<i64: 1, 3, 2, 128>}]} {
    %c0 = arith.constant 0 : index
    %c0_0 = arith.constant 0 : index
    %c0_1 = arith.constant 0 : index
    %c0_2 = arith.constant 0 : index
    %0 = vector.load %arg2[%c0, %c0_0, %c0_1, %c0_2] : memref<1x3x2x128xf32, #tpu.memory_space<vmem>>, vector<1x3x2x128xf32>
    %c0_3 = arith.constant 0 : index
    %c0_4 = arith.constant 0 : index
    %c0_5 = arith.constant 0 : index
    %c0_6 = arith.constant 0 : index
    %1 = vector.load %arg3[%c0_3, %c0_4, %c0_5, %c0_6] : memref<1x3x2x128xf32, #tpu.memory_space<vmem>>, vector<1x3x2x128xf32>
    %2 = arith.mulf %0, %1 : vector<1x3x2x128xf32>
    %cst = arith.constant dense<0.000000e+00> : vector<1x2x128xf32>
    %3 = vector.multi_reduction <add>, %2, %cst [1] : vector<1x3x2x128xf32> to vector<1x2x128xf32>
    %4 = vector.shape_cast %3 : vector<1x2x128xf32> to vector<1x1x2x128xf32>
    %5 = arith.mulf %0, %0 : vector<1x3x2x128xf32>
    %cst_7 = arith.constant dense<0.000000e+00> : vector<1x2x128xf32>
    %6 = vector.multi_reduction <add>, %5, %cst_7 [1] : vector<1x3x2x128xf32> to vector<1x2x128xf32>
    %7 = vector.shape_cast %6 : vector<1x2x128xf32> to vector<1x1x2x128xf32>
    %8 = arith.mulf %1, %1 : vector<1x3x2x128xf32>
    %cst_8 = arith.constant dense<0.000000e+00> : vector<1x2x128xf32>
    %9 = vector.multi_reduction <add>, %8, %cst_8 [1] : vector<1x3x2x128xf32> to vector<1x2x128xf32>
    %10 = vector.shape_cast %9 : vector<1x2x128xf32> to vector<1x1x2x128xf32>
    %11 = arith.mulf %7, %10 : vector<1x1x2x128xf32>
    %cst_9 = arith.constant 1.000000e-16 : f32
    %12 = vector.broadcast %cst_9 : f32 to vector<1x1x2x128xf32>
    %13 = arith.maximumf %11, %12 : vector<1x1x2x128xf32>
    %14 = math.rsqrt %13 : vector<1x1x2x128xf32>
    %15 = arith.mulf %4, %14 : vector<1x1x2x128xf32>
    %cst_10 = arith.constant 0.00999999977 : f32
    %16 = vector.broadcast %cst_10 : f32 to vector<1x1x2x128xf32>
    %17 = arith.subf %16, %15 : vector<1x1x2x128xf32>
    %cst_11 = arith.constant 0.000000e+00 : f32
    %18 = vector.broadcast %cst_11 : f32 to vector<1x1x2x128xf32>
    %19 = arith.maximumf %17, %18 : vector<1x1x2x128xf32>
    %20 = vector.broadcast %19 : vector<1x1x2x128xf32> to vector<1x3x2x128xf32>
    %21 = arith.mulf %1, %20 : vector<1x3x2x128xf32>
    %22 = arith.addf %0, %21 : vector<1x3x2x128xf32>
    %23 = arith.mulf %22, %22 : vector<1x3x2x128xf32>
    %cst_12 = arith.constant dense<0.000000e+00> : vector<1x2x128xf32>
    %24 = vector.multi_reduction <add>, %23, %cst_12 [1] : vector<1x3x2x128xf32> to vector<1x2x128xf32>
    %25 = vector.shape_cast %24 : vector<1x2x128xf32> to vector<1x1x2x128xf32>
    %cst_13 = arith.constant 1.000000e-24 : f32
    %26 = vector.broadcast %cst_13 : f32 to vector<1x1x2x128xf32>
    %27 = arith.maximumf %25, %26 : vector<1x1x2x128xf32>
    %28 = math.rsqrt %27 : vector<1x1x2x128xf32>
    %29 = vector.broadcast %28 : vector<1x1x2x128xf32> to vector<1x3x2x128xf32>
    %30 = arith.mulf %22, %29 : vector<1x3x2x128xf32>
    %c0_14 = arith.constant 0 : index
    %c0_15 = arith.constant 0 : index
    %c0_16 = arith.constant 0 : index
    %c0_17 = arith.constant 0 : index
    %31 = vector.load %arg4[%c0_14, %c0_15, %c0_16, %c0_17] : memref<1x3x2x128xf32, #tpu.memory_space<vmem>>, vector<1x3x2x128xf32>
    tpu.vector_store %arg4[%c0_14, %c0_15, %c0_16, %c0_17], %30 {strides = array<i32>} : memref<1x3x2x128xf32, #tpu.memory_space<vmem>>, vector<1x3x2x128xf32>,
    return
  }
  func.func @transform_0(%arg0: i32, %arg1: i32) -> (i32, i32, i32, i32) {
    %c0_i32 = arith.constant 0 : i32
    %c0_i32_0 = arith.constant 0 : i32
    %c0_i32_1 = arith.constant 0 : i32
    return %arg0, %c0_i32, %arg1, %c0_i32_0 : i32, i32, i32, i32
  }
  func.func @transform_1(%arg0: i32, %arg1: i32) -> (i32, i32, i32, i32) {
    %c0_i32 = arith.constant 0 : i32
    %c0_i32_0 = arith.constant 0 : i32
    %c0_i32_1 = arith.constant 0 : i32
    return %arg0, %c0_i32, %arg1, %c0_i32_0 : i32, i32, i32, i32
  }
  func.func @transform_2(%arg0: i32, %arg1: i32) -> (i32, i32, i32, i32) {
    %c0_i32 = arith.constant 0 : i32
    %c0_i32_0 = arith.constant 0 : i32
    %c0_i32_1 = arith.constant 0 : i32
    return %arg0, %c0_i32, %arg1, %c0_i32_0 : i32, i32, i32, i32
  }
}

</mosaic_0001>

<bundles_post_ra>
// kernel: tpu_custom_call.1
= control target key start
LH: loop header
LB: loop body
LE: loop exit
PB: predicated region body
PF: predicated region fallthrough
CT: control target
= control target key end

     0   :  { %7 = vsyncpa [#allocation3], 0  ;;  %s846_s0 = inlined_call_operand.hbm [shape: f32[2,3,2,128], index: 0, kind: input, shape index: {}]   ;;  %s847_s1 = inlined_call_operand.hbm [shape: f32[2,3,2,128], index: 1, kind: input, shape index: {}]   ;;  %s848_s2 = inlined_call_operand.hbm [shape: f32[2,3,2,128], index: 2, kind: output, shape index: {}]  }
   0x1   :  { %9 = vsyncpa [#allocation3 + $0x1], 0 }
   0x2   :  { %10 = vsyncpa [#allocation6], 0 }
   0x3   :  { %12 = vsyncpa [#allocation6 + $0x1], 0 }
   0x4   :  { %13 = vsyncpa [#allocation4], 0 }
   0x5   :  { %15 = vsyncpa [#allocation4 + $0x1], 0  ;;  %s688_s9 = smov 0   ;;  %s690_s10 = smov 0  }
   0x6   :  { %s692_s11 = smov 0   ;;  %s694_s12 = smov 0  }
   0x7   :  { %s696_s13 = smov 0   ;;  %s698_s14 = smov 0  }
   0x8 LB: > { %s430_s15 = sadd.s32 4294967295, %s667_s14   ;;  %s431_s16 = sadd.s32 4294967294, %s667_s14   ;;  %s667_s14 = sphi %s698_s14, %s21_s14   ;;  %s663_s13 = sphi %s696_s13, %s858_s13   ;;  %s659_s12 = sphi %s694_s12, %s857_s12   ;;  %s655_s11 = sphi %s692_s11, %s856_s11   ;;  %s651_s10 = sphi %s690_s10, %s855_s10   ;;  %s647_s9 = sphi %s688_s9, %s854_s9  }
   0x9   : > { %s33_s17 = sadd.s32 1, %s663_s13  ;;  %s42_s18 = sadd.s32 1, %s655_s11 }
   0xa   : > { %p35_p0 = scmp.ge.s32.totalorder %s33_s17, 2  ;;  %p49_p1 = scmp.ne.s32.totalorder %s655_s11, %s651_s10 }
   0xb   : > { %p50_p2 = scmp.eq.s32.totalorder %s667_s14, 0  ;;  %p55_p3 = scmp.ne.s32.totalorder %s651_s10, %s647_s9 }
   0xc   : > { %s860_s17 = smov (%p35_p0, %s33_s17), 0  ;;  %p56_p5 = scmp.eq.s32.totalorder %s430_s15, 0 }
   0xd   : > { %p729_p4 = por %p50_p2, %p49_p1  ;;  %s37_s20 = ssub.s32 %s663_s13, %s860_s17 }
   0xe   : > { %p109_p6 = scmp.eq.s32.totalorder %s430_s15, 1  ;;  %p40_p7 = scmp.eq.s32.totalorder %s37_s20, 0 }
   0xf   : > { %p735_p8 = por %p56_p5, %p55_p3  ;;  %p115_p10 = scmp.eq.s32.totalorder %s431_s16, 1 }
  0x10   : > { %p739_p9 = por %p109_p6, %p49_p1  ;;  %p433_p12 = scmp.ge.s32.totalorder %s667_s14, 2 }
  0x11   : > { %s744_s23 = scalar_select %p40_p7, %s655_s11, %s42_s18  }
  0x12   : > { %p746_p11 = por %p115_p10, %p55_p3  ;;  %p463_p13 = scmp.lt.s32.totalorder %s667_s14, 2 }
  0x13   : > { %s753_s25 = sand.u32 1, %s655_s11   ;;  %s441_s27 = smul.u32 6, %s663_s13 }
  0x14   : > { %s440_s26 = smul.u32 6, %s753_s25  ;;  %p759_p0 = pnand %p463_p13, %p729_p4 }
  0x15   : > { %s145_s3 = scalar_lea.hbm %s846_s0, %s441_s27  ;;  %p436_p1 = scmp.ge.s32.totalorder %s667_s14, 1 }
  0x16   : > { %s139_s4 = scalar_lea.vmem [#allocation2], %s440_s26  ;;  %s146_s6 = sshll.u32 %s145_s3, 4  ;;  %s147_s6 = int_to_ptr.hbm [resolvable:$true] %s146_s6 }
  0x17   : > { %s148_s5 = sshll.u32 %s139_s4, 4  ;;  %s136_s7 = scalar_lea.sflag [#allocation3], %s753_s25  ;;  %s149_s5 = int_to_ptr.vmem [resolvable:$true] %s148_s5 }
  0x18   : > { %s669_s8 = smov 32   ;;  %s670_s15 = smov 2  }
  0x19   : > { %455 = dma.hbm_to_vmem [thread:$0]  (!%p759_p0), %s147_s6, 96, %s149_s5, %s136_s7, %s669_s8, %s669_s8, %s670_s15  }
  0x1a   : > { %p179_p2 = scmp.lt.s32.totalorder %s667_s14, 3  ;;  %s168_s19 = scalar_lea.hbm %s847_s1, %s441_s27 }
  0x1b   : > { %s169_s20 = sshll.u32 %s168_s19, 4  ;;  %s162_s29 = scalar_lea.vmem [#allocation5], %s440_s26  ;;  %s170_s20 = int_to_ptr.hbm [resolvable:$true] %s169_s20 }
  0x1c   : > { %p180_p3 = pnand %p436_p1, %p179_p2  ;;  %s171_s30 = sshll.u32 %s162_s29, 4  ;;  %s172_s30 = int_to_ptr.vmem [resolvable:$true] %s171_s30 }
  0x1d   : > { %s159_s3 = scalar_lea.sflag [#allocation6], %s753_s25  ;;  %s778_s4 = sand.u32 (!%p180_p3), 1, %s651_s10  }
  0x1e   : > { %458 = dma.hbm_to_vmem [thread:$0]  (!%p759_p0), %s170_s20, 96, %s172_s30, %s159_s3, %s669_s8, %s669_s8, %s670_s15  }
  0x1f   : > { %183 = sbr.rel (%p180_p3) target bundleno = 115 (0x73), region = 28  ;;  %s186_s27 = scalar_lea.sflag (!%p180_p3), [#allocation3], %s778_s4 }
  0x20   : > { %s781_s5 = smul.u32 (!%p180_p3), 6, %s778_s4 }
  0x22   : > { %s189_s6 = scalar_lea.vmem (!%p180_p3), [#allocation2], %s781_s5 }
  0x24   : > { %634 = dma.done.wait (%p735_p8), %s186_s27, 96  }
  0x25   : > { %636 = vsyncadd (%p735_p8), %s186_s27, 4294967200  ;;  %s196_s25 = scalar_lea.sflag [#allocation6], %s778_s4  ;;  %s199_s26 = scalar_lea.vmem [#allocation5], %s781_s5 }
  0x26   : > { %638 = dma.done.wait (%p735_p8), %s196_s25, 96  }
  0x27   : > { %640 = vsyncadd (%p735_p8), %s196_s25, 4294967200  ;;  %vm235_vm0 = vcmask 1041408   ;;  %v226_v0 = vld [vmem:[%s189_s6] sm:$0x3]  ;;  %v227_v1 = vld [vmem:[%s189_s6 + $0x2] sm:$0x3] }
  0x28   : > { %v228_v2 = vld [vmem:[%s189_s6 + $0x4] sm:$0x3]  ;;  %v229_v3 = vld [vmem:[%s199_s26] sm:$0x3]  ;;  %v230_v4 = vld [vmem:[%s199_s26 + $0x2] sm:$0x3]  ;;  %v241_v5 = vmul.f32 %v226_v0, %v226_v0  ;;  %v242_v6 = vmul.f32 %v227_v1, %v227_v1 }
  0x29   : > { %v243_v7 = vmul.f32 %v228_v2, %v228_v2  ;;  %v231_v8 = vld [vmem:[%s199_s26 + $0x4] sm:$0x3]  ;;  %v249_v9 = vmul.f32 %v229_v3, %v229_v3  ;;  %v250_v13 = vmul.f32 %v230_v4, %v230_v4  ;;  %v232_v24 = vmul.f32 %v229_v3, %v226_v0  ;;  %s445_s21 = smul.u32 6, %s659_s12  ;;  %s225_s15 = scalar_lea.vmem [#allocation7], %s781_s5 }
  0x2a   : > { %v244_v10 = vsel %vm235_vm0, %v241_v5, 0.0  ;;  %v245_v11 = vsel %vm235_vm0, %v242_v6, 0.0  ;;  %v251_v15 = vmul.f32 %v231_v8, %v231_v8  ;;  %v233_v25 = vmul.f32 %v230_v4, %v227_v1  ;;  %s317_s16 = sshll.u32 %s225_s15, 4  ;;  %s304_s12 = scalar_lea.sflag [#allocation4], %s778_s4  ;;  %s318_s16 = int_to_ptr.vmem [resolvable:$true] %s317_s16 }
  0x2b   : > { %v247_v12 = vsel %vm235_vm0, %v243_v7, 0.0  ;;  %v246_v14 = vadd.f32 %v245_v11, %v244_v10  ;;  %v252_v16 = vsel %vm235_vm0, %v249_v9, 0.0  ;;  %v253_v17 = vsel %vm235_vm0, %v250_v13, 0.0  ;;  %s316_s8 = scalar_lea.hbm %s848_s2, %s445_s21  ;;  %s601_s3 = scalar_lea.hbm %s848_s2, 12 }
  0x2c   : > { %v254_v19 = vadd.f32 %v253_v17, %v252_v16  ;;  %v255_v20 = vsel %vm235_vm0, %v251_v15, 0.0  ;;  %v234_v27 = vmul.f32 %v231_v8, %v228_v2  ;;  %v236_v28 = vsel %vm235_vm0, %v232_v24, 0.0  ;;  %s319_s18 = sshll.u32 %s316_s8, 4  ;;  %s320_s18 = int_to_ptr.hbm [resolvable:$true] %s319_s18 }
  0x2d   : > { %v248_v18 = vadd.f32 %v247_v12, %v246_v14  ;;  %v237_v29 = vsel %vm235_vm0, %v233_v25, 0.0  ;;  %s595_s19 = sshra.s32 %s320_s18, 4  ;;  %s596_s19 = int_to_ptr.hbm [resolvable:$true] %s595_s19 }
  0x2e   : > { %v256_v21 = vadd.f32 %v255_v20, %v254_v19  ;;  %v238_v32 = vadd.f32 %v237_v29, %v236_v28  ;;  %v239_v33 = vsel %vm235_vm0, %v234_v27, 0.0  ;;  %s597_s20 = scalar_lea.hbm %s596_s19, 6  ;;  %p602_p7 = scmp.lt.s32.totalorder %s596_s19, %s848_s2 }
  0x2f   : > { %p598_p4 = scmp.ne.s32.totalorder %s596_s19, %s597_s20  ;;  %p603_p8 = scmp.lt.s32.totalorder %s601_s3, %s597_s20 }
  0x30   : > { %v257_v22 = vmul.f32 %v256_v21, %v248_v18  ;;  %v240_v36 = vadd.f32 %v239_v33, %v238_v32 }
  0x31   : > { %p599_p5 = pnand %p598_p4, %p739_p9  ;;  %p604_p10 = por %p603_p8, %p602_p7 }
  0x32   : > { %v258_v23 = vmax.f32 %v257_v22, 1e-16 }
  0x33   : > { %p600_p6 = pneg %p599_p5 }
  0x34   : > { %517 = vrsqrt.f32 %v258_v23  ;;  %vm265_vm1 = vweird.f32 %v258_v23 }
  0x35   : > { %p605_p13 = pnand %p604_p10, %p600_p6 }
  0x3a   : > { %v518_v26 = vpop.eup %517 }
  0x3b   : > { %v260_v30 = vmul.f32 %v518_v26, %v258_v23  ;;  %vm266_vm2 = vweird.f32 %v518_v26 }
  0x3c   : > { %vm267_vm3 = vmor %vm265_vm1, %vm266_vm2 }
  0x3d   : > { %v261_v31 = vmul.f32 %v518_v26, %v260_v30 }
  0x3f   : > { %v262_v34 = vmul.f32 0.5, %v261_v31 }
  0x41   : > { %v263_v35 = vsub.f32 1.5, %v262_v34 }
  0x43   : > { %v264_v37 = vmul.f32 %v518_v26, %v263_v35 }
  0x45   : > { %v268_v38 = vsel %vm267_vm3, %v518_v26, %v264_v37 }
  0x46   : > { %v269_v39 = vmul.f32 %v268_v38, %v240_v36 }
  0x48   : > { %v270_v40 = vsub.f32 0.01, %v269_v39 }
  0x4a   : > { %v271_v41 = vmax.f32 %v270_v40, 0.0 }
  0x4c   : > { %v272_v42 = vmul.f32 %v271_v41, %v229_v3  ;;  %v273_v43 = vmul.f32 %v271_v41, %v230_v4  ;;  %v274_v44 = vmul.f32 %v271_v41, %v231_v8 }
  0x4e   : > { %v275_v45 = vadd.f32 %v272_v42, %v226_v0  ;;  %v276_v46 = vadd.f32 %v273_v43, %v227_v1  ;;  %v277_v47 = vadd.f32 %v274_v44, %v228_v2 }
  0x50   : > { %v278_v48 = vmul.f32 %v275_v45, %v275_v45  ;;  %v279_v49 = vmul.f32 %v276_v46, %v276_v46  ;;  %v280_v50 = vmul.f32 %v277_v47, %v277_v47 }
  0x52   : > { %v281_v51 = vsel %vm235_vm0, %v278_v48, 0.0  ;;  %v282_v52 = vsel %vm235_vm0, %v279_v49, 0.0  ;;  %v284_v53 = vsel %vm235_vm0, %v280_v50, 0.0 }
  0x53   : > { %v283_v54 = vadd.f32 %v282_v52, %v281_v51 }
  0x55   : > { %v285_v55 = vadd.f32 %v284_v53, %v283_v54 }
  0x57   : > { %v286_v56 = vmax.f32 %v285_v55, 1e-24 }
  0x59   : > { %519 = vrsqrt.f32 %v286_v56  ;;  %vm293_vm4 = vweird.f32 %v286_v56 }
  0x5f   : > { %v520_v57 = vpop.eup %519 }
  0x60   : > { %v288_v58 = vmul.f32 %v520_v57, %v286_v56  ;;  %vm294_vm5 = vweird.f32 %v520_v57 }
  0x61   : > { %vm295_vm6 = vmor %vm293_vm4, %vm294_vm5 }
  0x62   : > { %v289_v59 = vmul.f32 %v520_v57, %v288_v58 }
  0x64   : > { %v290_v60 = vmul.f32 0.5, %v289_v59 }
  0x66   : > { %v291_v61 = vsub.f32 1.5, %v290_v60 }
  0x68   : > { %v292_v62 = vmul.f32 %v520_v57, %v291_v61 }
  0x6a   : > { %v296_v63 = vsel %vm295_vm6, %v520_v57, %v292_v62 }
  0x6b   : > { %v297_v0 = vmul.f32 %v296_v63, %v275_v45  ;;  %v298_v1 = vmul.f32 %v296_v63, %v276_v46  ;;  %v299_v2 = vmul.f32 %v296_v63, %v277_v47 }
  0x6d   : > { %300 = vst [vmem:[%s225_s15] sm:$0x3] %v297_v0 }
  0x6e   : > { %301 = vst [vmem:[%s225_s15 + $0x2] sm:$0x3] %v298_v1 }
  0x6f   : > { %302 = vst [vmem:[%s225_s15 + $0x4] sm:$0x3] %v299_v2 }
  0x70   : > { %608 = shalt.err (!%p605_p13)
}
  0x71   : > { %s671_s4 = smov 32   ;;  %s672_s6 = smov 2  }
  0x72   : > { %450 = dma.vmem_to_hbm [thread:$0]  (%p739_p9), %s318_s16, 96, %s320_s18, %s304_s12, %s671_s4, %s671_s4, %s672_s6  }
  0x73 PF: > { %s334_s25 = sand.u32 1, %s647_s9   ;;  %p460_p0 = pnand %p433_p12, %p746_p11 }
  0x74   : > { %s335_s26 = scalar_lea.sflag [#allocation4], %s334_s25 }
  0x75   : > { %p461_p1 = pneg %p460_p0 }
  0x77   : > { %642 = dma.done.wait (%p461_p1), %s335_s26, 96  }
  0x78   : > { %644 = vsyncadd (%p461_p1), %s335_s26, 4294967200  ;;  %s21_s14 = sadd.s32 1, %s667_s14   ;;  %s854_s9 = smov %s651_s10 }
  0x79   : > { %p18_p2 = scmp.ge.s32.totalorder %s21_s14, 4   ;;  %s855_s10 = smov %s655_s11 }
  0x7a   : > { %s856_s11 = smov %s744_s23  ;;  %s857_s12 = smov %s663_s13 }
  0x7b   : > { %s858_s13 = smov %s860_s17  ;;  %20 = sbr.rel (!%p18_p2) target bundleno = 8 (0x8), region = 86 }
  0x80   :  { %341 = vsyncpa [#allocation3], 1 }
  0x81   :  { %343 = vsyncpa [#allocation3 + $0x1], 1 }
  0x82   :  { %344 = vsyncpa [#allocation6], 1 }
  0x83   :  { %346 = vsyncpa [#allocation6 + $0x1], 1 }
  0x84   :  { %347 = vsyncpa [#allocation4], 1 }
  0x85   :  { %349 = vsyncpa [#allocation4 + $0x1], 1 }

</bundles_post_ra>
